<compile_context>
chip_gen: v6e
topology: v6e:2x2x1
jax: 0.10.0
libtpu: 0.0.40
codegen_flags: <defaults>
</compile_context>

<pallas_src>
import jax
import jax.numpy as jnp
from jax import lax
from jax.experimental import pallas as pl
from jax.experimental.pallas import tpu as pltpu

LANES = 128      # vreg lane width
ACC_ROWS = 8     # f32 sublane tile -> per-core accumulator block is one vreg


def _round_up(x, m):
    return ((x + m - 1) // m) * m


def _tpu_defaults():
    """Return (num_cores, block_rows, vmem_limit_bytes) tuned per TPU generation.

    * v7x : 2 TensorCores, ~3.2 TB/s HBM, 64 MiB VMEM -> shard rows across both
            cores, 4 MiB input blocks, modest VMEM cap.
    * v4/v5p (megacore): 2 cores, 2 MiB input blocks.
    * v5e/v6e (single TC): 1 core, 2 MiB input blocks; raise the scoped-VMEM
            limit (physical VMEM is 128 MiB) so big tiles never hit the
            16/32 MiB default.
    * unknown backend: conservative settings.
    """
    kind = ""
    try:
        kind = jax.devices()[0].device_kind.lower().replace(" ", "")
    except Exception:
        pass
    if "v7" in kind or "7x" in kind:
        return 2, 8192, 48 * 1024 * 1024
    if "v6" in kind:
        return 1, 4096, 64 * 1024 * 1024
    if "v5p" in kind or "v4" in kind:
        return 2, 4096, 64 * 1024 * 1024
    if "v5" in kind:
        return 1, 4096, 64 * 1024 * 1024
    return 1, 2048, None


def _make_nll_kernel(n_valid, block_rows, blocks_per_core):
    """Kernel closure over static sizes (true N, tile rows, inner grid extent)."""
    block_elems = block_rows * LANES

    def kernel(pos_ref, neg_ref, out_ref):
        c = pl.program_id(0)   # core index (outer, "parallel")
        i = pl.program_id(1)   # block index within this core (inner, "arbitrary")

        @pl.when(i == 0)
        def _init():
            out_ref[...] = jnp.zeros_like(out_ref)

        pos = pos_ref[...].astype(jnp.float32)
        neg = neg_ref[...].astype(jnp.float32)

        # -log_softmax([pos, neg])[:, 0] = logsumexp(pos, neg) - pos
        #                                = softplus(neg - pos)   (stable form)
        d = neg - pos
        loss = jnp.maximum(d, 0.0) + jnp.log1p(jnp.exp(-jnp.abs(d)))

        def _reduce(tile):
            # (block_rows, 128) -> (8, 128): VALU-only partial reduction so the
            # resident accumulator RMW is a single vreg per grid step.
            return tile.reshape(-1, ACC_ROWS, LANES).sum(axis=0)

        # Logical (un-clamped) element offset of this grid step. Only blocks
        # that stick out past the true element count need masking; everything
        # else takes the cheap path.
        start = (c * blocks_per_core + i) * block_elems
        needs_mask = start + block_elems > n_valid

        @pl.when(needs_mask)
        def _masked_tail():
            ridx = lax.broadcasted_iota(jnp.int32, (block_rows, LANES), 0)
            lidx = lax.broadcasted_iota(jnp.int32, (block_rows, LANES), 1)
            local = ridx * LANES + lidx
            # Pad rows / out-of-bounds garbage rows all have local >= n - start
            # (negative rhs for fully-overhanging blocks => everything masked).
            keep = local < (n_valid - start)
            out_ref[...] += _reduce(jnp.where(keep, loss, 0.0))

        @pl.when(jnp.logical_not(needs_mask))
        def _full_block():
            out_ref[...] += _reduce(loss)

    return kernel


def multiclass_nll(pos_scores, neg_scores, *, block_rows=None, num_cores=None):
    """Pallas implementation of MulticlassNLL.forward for 1-D score vectors.

    loss = mean(softplus(neg - pos)) == -mean(log_softmax([pos, neg])[:, 0])

    * Any N works; ragged tails are masked inside the kernel, so 128-aligned N
      incurs no extra HBM traffic at all.
    * f32 or bf16 inputs are supported; bf16 halves the dominant HBM stream
      (near-2x wall clock) while accumulation stays in f32.
    """
    assert pos_scores.shape == neg_scores.shape
    assert pos_scores.ndim == 1
    n = int(pos_scores.shape[0])
    dtype = pos_scores.dtype

    det_cores, det_rows, vmem_limit = _tpu_defaults()
    if num_cores is None:
        num_cores = det_cores
    if block_rows is None:
        block_rows = det_rows

    # Input sublane granularity: 8 rows for 32-bit, 16 for 16-bit dtypes.
    sub = 16 if jnp.dtype(dtype).itemsize == 2 else 8

    rows = pl.cdiv(n, LANES)
    padded_rows = max(rows, sub)
    padded_n = padded_rows * LANES
    if padded_n != n:
        # Only hit when N isn't a multiple of 128 (or is tiny): pad up to one
        # full 128-lane row group. The in-kernel mask zeroes the pad exactly.
        # TODO(synk): a 1-D-block variant could remove this copy for unaligned N.
        pad = padded_n - n
        pos_scores = jnp.pad(pos_scores, (0, pad))
        neg_scores = jnp.pad(neg_scores, (0, pad))

    pos2 = pos_scores.reshape(padded_rows, LANES)   # contiguous reshape: free
    neg2 = neg_scores.reshape(padded_rows, LANES)

    # Never use more cores than there are sublane groups of work.
    num_cores = max(1, min(num_cores, padded_rows // sub))

    rows_per_core = pl.cdiv(padded_rows, num_cores)
    br = max(sub, min(block_rows, _round_up(rows_per_core, sub)))
    br = _round_up(br, sub)
    blocks_per_core = pl.cdiv(rows_per_core, br)

    # Clamp the input block index so a fully-overhanging (all-masked) block
    # never issues an out-of-bounds DMA; its contribution is masked to zero.
    last_block = pl.cdiv(padded_rows, br) - 1
    in_map = lambda c, i: (jnp.minimum(c * blocks_per_core + i, last_block), 0)
    out_map = lambda c, i: (c, 0)   # per-core resident (8, 128) accumulator

    kernel = _make_nll_kernel(n, br, blocks_per_core)

    cp_kwargs = dict(dimension_semantics=("parallel", "arbitrary"))
    if vmem_limit is not None:
        cp_kwargs["vmem_limit_bytes"] = vmem_limit

    partials = pl.pallas_call(
        kernel,
        out_shape=jax.ShapeDtypeStruct((num_cores * ACC_ROWS, LANES), jnp.float32),
        grid_spec=pltpu.PrefetchScalarGridSpec(
            num_scalar_prefetch=0,
            grid=(num_cores, blocks_per_core),
            in_specs=[
                pl.BlockSpec((br, LANES), in_map),
                pl.BlockSpec((br, LANES), in_map),
            ],
            out_specs=pl.BlockSpec((ACC_ROWS, LANES), out_map),
        ),
        compiler_params=pltpu.CompilerParams(**cp_kwargs),
    )(pos2, neg2)

    # Tiny epilogue: sum of at most (2*8, 128) f32 partials, divide by true N.
    return jnp.sum(partials) / jnp.float32(n)


def multiclass_nll_ref(pos_scores, neg_scores):
    """Pure-JAX reference mirroring the PyTorch module exactly."""
    scores = jnp.stack([pos_scores, neg_scores], axis=1)  # (N, 2)
    log_probs = jax.nn.log_softmax(scores, axis=1)
    return -jnp.mean(log_probs[:, 0])


if __name__ == "__main__":
    key = jax.random.PRNGKey(0)
    k1, k2 = jax.random.split(key)

    # Lane-aligned N: zero-copy streaming path.
    N = 2048
    pos = jax.random.normal(k1, (N,), dtype=jnp.float32) * 2.0
    neg = jax.random.normal(k2, (N,), dtype=jnp.float32) * 2.0

    loss = jax.block_until_ready(multiclass_nll(pos, neg))
    ref = multiclass_nll_ref(pos, neg)
    assert jnp.allclose(loss, ref, rtol=1e-5, atol=1e-5), (loss, ref)

    # Ragged N (not a multiple of 128): exercises the in-kernel tail mask.
    M = 1000
    loss2 = jax.block_until_ready(multiclass_nll(pos[:M], neg[:M]))
    ref2 = multiclass_nll_ref(pos[:M], neg[:M])
    assert jnp.allclose(loss2, ref2, rtol=1e-5, atol=1e-5), (loss2, ref2)

    # Multi-block accumulation + 2-core split + masked/clamped overhang blocks
    # (forced small tiles so the path is exercised without huge inputs).
    P = 5000
    k3, k4 = jax.random.split(k2)
    pos3 = jax.random.normal(k3, (P,), dtype=jnp.float32)
    neg3 = jax.random.normal(k4, (P,), dtype=jnp.float32)
    loss3 = jax.block_until_ready(
        multiclass_nll(pos3, neg3, block_rows=8, num_cores=2))
    ref3 = multiclass_nll_ref(pos3, neg3)
    assert jnp.allclose(loss3, ref3, rtol=1e-5, atol=1e-5), (loss3, ref3)

    print("KERNEL_OK")
</pallas_src>

<mosaic_0001>
module attributes {stable_mosaic.version = 11 : i64} {
  func.func @kernel(%arg0: i32, %arg1: i32, %arg2: memref<16x128xf32, #tpu.memory_space<vmem>>, %arg3: memref<16x128xf32, #tpu.memory_space<vmem>>, %arg4: memref<8x128xf32, #tpu.memory_space<vmem>>) attributes {dimension_semantics = [#tpu.dimension_semantics<parallel>, #tpu.dimension_semantics<arbitrary>], iteration_bounds = array<i64: 1, 1>, scalar_prefetch = 0 : i64, scratch_operands = 0 : i64, tpu.core_type = #tpu.core_type<tc>, window_params = [{transform_indices = @transform_0, window_bounds = array<i64: 16, 128>}, {transform_indices = @transform_1, window_bounds = array<i64: 16, 128>}, {transform_indices = @transform_2, window_bounds = array<i64: 8, 128>}]} {
    %c0_i32 = arith.constant 0 : i32
    %0 = arith.cmpi eq, %arg1, %c0_i32 : i32
    %1 = arith.extui %0 : i1 to i32
    %c0_i32_0 = arith.constant 0 : i32
    %2 = arith.cmpi ne, %1, %c0_i32_0 : i32
    scf.if %2 {
      %cst_9 = arith.constant 0.000000e+00 : f32
      %24 = vector.broadcast %cst_9 : f32 to vector<8x128xf32>
      %c0_10 = arith.constant 0 : index
      %c0_11 = arith.constant 0 : index
      %25 = vector.load %arg4[%c0_10, %c0_11] : memref<8x128xf32, #tpu.memory_space<vmem>>, vector<8x128xf32>
      tpu.vector_store %arg4[%c0_10, %c0_11], %24 {strides = array<i32>} : memref<8x128xf32, #tpu.memory_space<vmem>>, vector<8x128xf32>,
    } else {
    }
    %c0 = arith.constant 0 : index
    %c0_1 = arith.constant 0 : index
    %3 = vector.load %arg2[%c0, %c0_1] : memref<16x128xf32, #tpu.memory_space<vmem>>, vector<16x128xf32>
    %c0_2 = arith.constant 0 : index
    %c0_3 = arith.constant 0 : index
    %4 = vector.load %arg3[%c0_2, %c0_3] : memref<16x128xf32, #tpu.memory_space<vmem>>, vector<16x128xf32>
    %5 = arith.subf %4, %3 : vector<16x128xf32>
    %cst = arith.constant 0.000000e+00 : f32
    %6 = vector.broadcast %cst : f32 to vector<16x128xf32>
    %7 = arith.maximumf %5, %6 : vector<16x128xf32>
    %8 = math.absf %5 : vector<16x128xf32>
    %cst_4 = arith.constant 0.000000e+00 : f32
    %9 = vector.broadcast %cst_4 : f32 to vector<16x128xf32>
    %10 = arith.subf %9, %8 : vector<16x128xf32>
    %11 = math.exp %10 : vector<16x128xf32>
    %12 = math.log1p %11 : vector<16x128xf32>
    %13 = arith.addf %7, %12 : vector<16x128xf32>
    %c1_i32 = arith.constant 1 : i32
    %14 = arith.muli %arg0, %c1_i32 : i32
    %15 = arith.addi %14, %arg1 : i32
    %c2048_i32 = arith.constant 2048 : i32
    %16 = arith.muli %15, %c2048_i32 : i32
    %c2048_i32_5 = arith.constant 2048 : i32
    %17 = arith.addi %16, %c2048_i32_5 : i32
    %c2048_i32_6 = arith.constant 2048 : i32
    %18 = arith.cmpi sgt, %17, %c2048_i32_6 : i32
    %19 = arith.extui %18 : i1 to i32
    %c0_i32_7 = arith.constant 0 : i32
    %20 = arith.cmpi ne, %19, %c0_i32_7 : i32
    scf.if %20 {
      %24 = tpu.iota {dimensions = array<i32: 0>} : vector<16x128xi32>
      %25 = tpu.iota {dimensions = array<i32: 1>} : vector<16x128xi32>
      %c128_i32 = arith.constant 128 : i32
      %26 = vector.broadcast %c128_i32 : i32 to vector<16x128xi32>
      %27 = arith.muli %24, %26 : vector<16x128xi32>
      %28 = arith.addi %27, %25 : vector<16x128xi32>
      %c2048_i32_9 = arith.constant 2048 : i32
      %29 = arith.subi %c2048_i32_9, %16 : i32
      %30 = vector.broadcast %29 : i32 to vector<16x128xi32>
      %31 = arith.cmpi slt, %28, %30 : vector<16x128xi32>
      %c0_10 = arith.constant 0 : index
      %c0_11 = arith.constant 0 : index
      %32 = vector.load %arg4[%c0_10, %c0_11] : memref<8x128xf32, #tpu.memory_space<vmem>>, vector<8x128xf32>
      %cst_12 = arith.constant 0.000000e+00 : f32
      %33 = vector.broadcast %cst_12 : f32 to vector<16x128xf32>
      %34 = arith.select %31, %13, %33 : vector<16x128xi1>, vector<16x128xf32>
      %35 = vector.shape_cast %34 : vector<16x128xf32> to vector<2x8x128xf32>
      %cst_13 = arith.constant dense<0.000000e+00> : vector<8x128xf32>
      %36 = vector.multi_reduction <add>, %35, %cst_13 [0] : vector<2x8x128xf32> to vector<8x128xf32>
      %37 = arith.addf %32, %36 : vector<8x128xf32>
      %c0_14 = arith.constant 0 : index
      %c0_15 = arith.constant 0 : index
      %38 = vector.load %arg4[%c0_14, %c0_15] : memref<8x128xf32, #tpu.memory_space<vmem>>, vector<8x128xf32>
      tpu.vector_store %arg4[%c0_14, %c0_15], %37 {strides = array<i32>} : memref<8x128xf32, #tpu.memory_space<vmem>>, vector<8x128xf32>,
    } else {
    }
    %true = arith.constant true
    %21 = arith.xori %18, %true : i1
    %22 = arith.extui %21 : i1 to i32
    %c0_i32_8 = arith.constant 0 : i32
    %23 = arith.cmpi ne, %22, %c0_i32_8 : i32
    scf.if %23 {
      %c0_9 = arith.constant 0 : index
      %c0_10 = arith.constant 0 : index
      %24 = vector.load %arg4[%c0_9, %c0_10] : memref<8x128xf32, #tpu.memory_space<vmem>>, vector<8x128xf32>
      %25 = vector.shape_cast %13 : vector<16x128xf32> to vector<2x8x128xf32>
      %cst_11 = arith.constant dense<0.000000e+00> : vector<8x128xf32>
      %26 = vector.multi_reduction <add>, %25, %cst_11 [0] : vector<2x8x128xf32> to vector<8x128xf32>
      %27 = arith.addf %24, %26 : vector<8x128xf32>
      %c0_12 = arith.constant 0 : index
      %c0_13 = arith.constant 0 : index
      %28 = vector.load %arg4[%c0_12, %c0_13] : memref<8x128xf32, #tpu.memory_space<vmem>>, vector<8x128xf32>
      tpu.vector_store %arg4[%c0_12, %c0_13], %27 {strides = array<i32>} : memref<8x128xf32, #tpu.memory_space<vmem>>, vector<8x128xf32>,
    } else {
    }
    return
  }
  func.func @transform_0(%arg0: i32, %arg1: i32) -> (i32, i32) {
    %c1_i32 = arith.constant 1 : i32
    %0 = arith.muli %arg0, %c1_i32 : i32
    %1 = arith.addi %0, %arg1 : i32
    %c0_i32 = arith.constant 0 : i32
    %2 = arith.minsi %1, %c0_i32 : i32
    %c0_i32_0 = arith.constant 0 : i32
    %c0_i32_1 = arith.constant 0 : i32
    return %2, %c0_i32_0 : i32, i32
  }
  func.func @transform_1(%arg0: i32, %arg1: i32) -> (i32, i32) {
    %c1_i32 = arith.constant 1 : i32
    %0 = arith.muli %arg0, %c1_i32 : i32
    %1 = arith.addi %0, %arg1 : i32
    %c0_i32 = arith.constant 0 : i32
    %2 = arith.minsi %1, %c0_i32 : i32
    %c0_i32_0 = arith.constant 0 : i32
    %c0_i32_1 = arith.constant 0 : i32
    return %2, %c0_i32_0 : i32, i32
  }
  func.func @transform_2(%arg0: i32, %arg1: i32) -> (i32, i32) {
    %c0_i32 = arith.constant 0 : i32
    %c0_i32_0 = arith.constant 0 : i32
    return %arg0, %c0_i32 : i32, i32
  }
}

</mosaic_0001>

<bundles_post_ra>
// kernel: tpu_custom_call.1
= control target key start
LH: loop header
LB: loop body
LE: loop exit
PB: predicated region body
PF: predicated region fallthrough
CT: control target
= control target key end

     0   :  { %7 = vsyncpa [#allocation3], 0  ;;  %s264_s0 = inlined_call_operand.hbm [shape: f32[16,128], index: 0, kind: input, shape index: {}]   ;;  %s265_s1 = inlined_call_operand.hbm [shape: f32[16,128], index: 1, kind: input, shape index: {}]   ;;  %s266_s2 = inlined_call_operand.hbm [shape: f32[8,128], index: 2, kind: output, shape index: {}]  }
   0x1   :  { %8 = vsyncpa [#allocation6], 0 }
   0x2   :  { %9 = vsyncpa [#allocation4], 0  ;;  %s235_s9 = smov [#allocation2]  }
   0x3   :  { %s21_s10 = sshll.u32 %s235_s9, 4  ;;  %s22_s10 = int_to_ptr.vmem [resolvable:$true] %s21_s10 }
   0x4   :  { %s177_s11 = scalar_lea.vmem %s22_s10, 256  ;;  %p182_p1 = scmp.lt.s32.totalorder %s22_s10, %s22_s10 }
   0x5   :  { %p178_p0 = scmp.ne.s32.totalorder %s22_s10, %s177_s11  ;;  %p183_p2 = scmp.lt.s32.totalorder %s177_s11, %s177_s11 }
   0x7   :  { %p184_p3 = por %p183_p2, %p182_p1 }
   0x9   :  { %p185_p4 = pnand %p184_p3, %p178_p0 }
   0xb   :  { %188 = shalt.err (!%p185_p4)
}
   0xc   :  { %s236_s12 = smov 128   ;;  %s237_s13 = smov 8  }
   0xd   :  { %27 = dma.hbm_to_vmem [thread:$0]  %s264_s0, 256, %s22_s10, [#allocation3], %s236_s12, %s236_s12, %s237_s13  }
   0xe   :  { %s238_s16 = smov [#allocation5]  }
   0xf   :  { %s39_s17 = sshll.u32 %s238_s16, 4  ;;  %s40_s17 = int_to_ptr.vmem [resolvable:$true] %s39_s17 }
  0x10   :  { %s197_s18 = scalar_lea.vmem %s40_s17, 256  ;;  %p202_p6 = scmp.lt.s32.totalorder %s40_s17, %s40_s17 }
  0x11   :  { %p198_p5 = scmp.ne.s32.totalorder %s40_s17, %s197_s18  ;;  %p203_p7 = scmp.lt.s32.totalorder %s197_s18, %s197_s18 }
  0x13   :  { %p204_p8 = por %p203_p7, %p202_p6 }
  0x15   :  { %p205_p9 = pnand %p204_p8, %p198_p5 }
  0x17   :  { %208 = shalt.err (!%p205_p9)
}
  0x18   :  { %45 = dma.hbm_to_vmem [thread:$0]  %s265_s1, 256, %s40_s17, [#allocation6], %s236_s12, %s236_s12, %s237_s13  }
  0x19   :  { %229 = dma.done.wait [#allocation3], 256  }
  0x1a   :  { %230 = vsyncadd [#allocation3], 4294967040 }
  0x1b   :  { %231 = dma.done.wait [#allocation6], 256  }
  0x1c   :  { %232 = vsyncadd [#allocation6], 4294967040  ;;  %v65_v0 = vld [vmem:[#allocation2] sm:$0xff]  ;;  %v66_v1 = vld [vmem:[#allocation2 + $0x8] sm:$0xff]  ;;  %s239_s0 = smov [#allocation7]  }
  0x1d   :  { %v67_v2 = vld [vmem:[#allocation5] sm:$0xff]  ;;  %v68_v3 = vld [vmem:[#allocation5 + $0x8] sm:$0xff]  ;;  %s141_s1 = sshll.u32 %s239_s0, 4  ;;  %s142_s1 = int_to_ptr.vmem [resolvable:$true] %s141_s1 }
  0x1e   :  { %v69_v4 = vsub.f32 %v67_v2, %v65_v0  ;;  %v70_v5 = vsub.f32 %v68_v3, %v66_v1  ;;  %s209_s21 = scalar_lea.vmem %s142_s1, 128  ;;  %p214_p11 = scmp.lt.s32.totalorder %s142_s1, %s142_s1 }
  0x1f   :  { %p210_p10 = scmp.ne.s32.totalorder %s142_s1, %s209_s21  ;;  %p215_p12 = scmp.lt.s32.totalorder %s209_s21, %s209_s21 }
  0x20   :  { %v73_v6 = vand.u32 2147483647, %v69_v4  ;;  %v74_v7 = vand.u32 2147483647, %v70_v5  ;;  %v71_v24 = vmax.f32 %v69_v4, 0.0  ;;  %v72_v27 = vmax.f32 %v70_v5, 0.0 }
  0x21   :  { %p216_p13 = por %p215_p12, %p214_p11 }
  0x22   :  { %v75_v8 = vsub.f32 0.0, %v73_v6  ;;  %v76_v9 = vsub.f32 0.0, %v74_v7 }
  0x23   :  { %p217_p0 = pnand %p216_p13, %p210_p10 }
  0x24   :  { %v77_v10 = vmul.f32 1.442695, %v75_v8  ;;  %v79_v11 = vmul.f32 1.442695, %v76_v9 }
  0x26   :  { %161 = vpow2.f32 %v77_v10 }
  0x27   :  { %163 = vpow2.f32 %v79_v11 }
  0x33   :  { %v162_v12 = vpop.eup %161 }
  0x34   :  { %v164_v13 = vpop.eup %163  ;;  %v81_v14 = vadd.f32 1.0, %v162_v12  ;;  %v84_v16 = vmul.f32 -0.5, %v162_v12  ;;  %v87_v19 = vand.u32 2147483647, %v162_v12 }
  0x35   :  { %v90_v15 = vadd.f32 1.0, %v164_v13  ;;  %v93_v17 = vmul.f32 -0.5, %v164_v13  ;;  %v96_v21 = vand.u32 2147483647, %v164_v13 }
  0x36   :  { %165 = vlog2.f32 %v81_v14  ;;  %v85_v18 = vadd.f32 1.0, %v84_v16  ;;  %vm88_vm0 = vcmp.lt.f32.partialorder %v87_v19, 0.0004427343 }
  0x37   :  { %167 = vlog2.f32 %v90_v15  ;;  %v94_v20 = vadd.f32 1.0, %v93_v17  ;;  %vm97_vm1 = vcmp.lt.f32.partialorder %v96_v21, 0.0004427343 }
  0x38   :  { %v86_v22 = vmul.f32 %v162_v12, %v85_v18 }
  0x39   :  { %v95_v25 = vmul.f32 %v164_v13, %v94_v20 }
  0x43   :  { %v166_v23 = vpop.eup %165 }
  0x44   :  { %v168_v26 = vpop.eup %167  ;;  %v83_v28 = vmul.f32 0.6931472, %v166_v23 }
  0x45   :  { %v92_v29 = vmul.f32 0.6931472, %v168_v26 }
  0x46   :  { %v89_v30 = vsel %vm88_vm0, %v86_v22, %v83_v28 }
  0x47   :  { %v98_v31 = vsel %vm97_vm1, %v95_v25, %v92_v29  ;;  %v99_v32 = vadd.f32 %v89_v30, %v71_v24 }
  0x48   :  { %v100_v33 = vadd.f32 %v98_v31, %v72_v27 }
  0x4a   :  { %v132_v34 = vadd.f32 %v100_v33, %v99_v32 }
  0x4c   :  { %134 = vst [vmem:[#allocation7] sm:$0xff] %v132_v34 }
  0x4d   :  { %220 = shalt.err (!%p217_p0)
}
  0x4e   :  { %144 = dma.vmem_to_hbm [thread:$0]  %s142_s1, 128, %s266_s2, [#allocation4]  }
  0x4f   :  { %233 = dma.done.wait [#allocation4], 128  }
  0x50   :  { %234 = vsyncadd [#allocation4], 4294967168 }
  0x51   :  { %148 = vsyncpa [#allocation3], 1 }
  0x52   :  { %149 = vsyncpa [#allocation6], 1 }
  0x53   :  { %150 = vsyncpa [#allocation4], 1 }

</bundles_post_ra>
